<compile_context>
chip_gen: v6e
topology: v6e:2x2x1
jax: 0.10.0
libtpu: 0.0.40
codegen_flags: <defaults>
</compile_context>

<pallas_src>
import jax
import jax.numpy as jnp
import numpy as np
from jax.experimental import pallas as pl
from jax.experimental.pallas import tpu as pltpu


def make_resblock_kernel(seg_len, mxu_dtype):
    """Kernel factory for a given per-batch segment length and MXU operand dtype."""

    def kernel(xs_ref, w1_ref, w2_ref, ws_ref, o_ref):
        # xs_ref: (Cin+1, N*L + 2)  batch folded into lanes at offset 1; row Cin = 1.0
        # w1_ref: (3, Cout, Cin+1)  k=3 taps; tap 1 (centre) column Cin carries b1
        # w2_ref: (Cout, Cout)      second 1x1 conv
        # ws_ref: (Cout, Cin+1)     1x1 shortcut; column Cin carries b2 + bs
        # o_ref:  (Cout, N*L)
        f32 = jnp.float32
        nl = o_ref.shape[-1]

        xs = xs_ref[...].astype(f32)          # no-op in the f32 path
        centre = xs[:, 1:1 + nl]              # x at folded position o
        left = xs[:, 0:nl]                    # x at o-1 (invalid at segment starts)
        right = xs[:, 2:2 + nl]               # x at o+1 (invalid at segment ends)

        # In-kernel replicate padding: at each per-batch segment edge the
        # out-of-range tap reads the edge element itself.  Lane shifts are XLU
        # work co-issuing under the MXU pushes; the fix-up is one select/tap.
        pos = jax.lax.broadcasted_iota(jnp.int32, centre.shape, 1) % seg_len
        x_prev = jnp.where(pos == 0, centre, left)
        x_next = jnp.where(pos == seg_len - 1, centre, right)

        cast = lambda a: a.astype(mxu_dtype)  # bf16 MXU operands on v6e/v7x

        # k=3 conv: three accumulating MXU pushes, f32 accumulation.  The ones
        # row times the centre-tap bias column adds b1 inside the matmul.
        y1 = jnp.dot(w1_ref[1], cast(centre), preferred_element_type=f32)
        y1 = y1 + jnp.dot(w1_ref[0], cast(x_prev), preferred_element_type=f32)
        y1 = y1 + jnp.dot(w1_ref[2], cast(x_next), preferred_element_type=f32)
        y1 = jnp.maximum(y1, 0.0)             # ReLU kept in f32 (v5e: no bf16 VPU)

        # 1x1 conv + 1x1 shortcut as two separate MXU pushes (no sublane
        # concat); (b2 + bs) rides the shortcut's bias column.
        out = jnp.dot(w2_ref[...], cast(y1), preferred_element_type=f32)
        out = out + jnp.dot(ws_ref[...], cast(centre), preferred_element_type=f32)
        o_ref[...] = jnp.maximum(out, 0.0).astype(o_ref.dtype)

    return kernel


def resblock_forward(x_ncl, params, *, mxu_dtype=jnp.float32):
    """x_ncl: (N, Cin, L) float32.  Returns (N, Cout, L) float32 (PyTorch layout)."""
    w1, b1, w2, b2, ws, bs = params
    N, Cin, L = x_ncl.shape
    Cout = w1.shape[0]
    S = Cin + 1                     # +1: ones row that carries the bias MACs
    NL = N * L

    # Fold the batch into the lane axis (single kernel step, lane-denser
    # stores) and append the ones row.  The two structural zero lanes only
    # give the +-1 tap views a uniform width; the replicate-pad values are
    # produced inside the kernel, so no padded copy of x round-trips HBM.
    xf = jnp.transpose(x_ncl, (1, 0, 2)).reshape(Cin, NL)
    xs = jnp.zeros((S, NL + 2), jnp.float32)
    xs = xs.at[:Cin, 1:1 + NL].set(xf)
    xs = xs.at[Cin, 1:1 + NL].set(1.0)

    # Weight prep (tiny, one-time): per-tap k=3 weights with b1 folded into
    # the centre tap's bias column; 1x1 shortcut with (b2 + bs) folded in.
    w1t = jnp.zeros((3, Cout, S), jnp.float32)
    w1t = w1t.at[:, :, :Cin].set(jnp.transpose(w1, (2, 0, 1)))
    w1t = w1t.at[1, :, Cin].set(b1)
    w2m = w2[:, :, 0]
    wsm = jnp.zeros((Cout, S), jnp.float32)
    wsm = wsm.at[:, :Cin].set(ws[:, :, 0])
    wsm = wsm.at[:, Cin].set(b2 + bs)

    # Optional bf16 MXU operands (review item for v6e/v7x); accumulation,
    # bias MACs and ReLU stay f32 inside the kernel.
    xs, w1t, w2m, wsm = [a.astype(mxu_dtype) for a in (xs, w1t, w2m, wsm)]

    out_f = pl.pallas_call(
        make_resblock_kernel(L, mxu_dtype),
        out_shape=jax.ShapeDtypeStruct((Cout, NL), jnp.float32),
        # Single step: whole operands resident in VMEM (a few KiB at toy size).
        in_specs=[pl.BlockSpec(memory_space=pltpu.MemorySpace.VMEM)] * 4,
        out_specs=pl.BlockSpec(memory_space=pltpu.MemorySpace.VMEM),
    )(xs, w1t, w2m, wsm)

    # Unfold lanes back to the PyTorch (N, Cout, L) layout.
    return jnp.transpose(out_f.reshape(Cout, N, L), (1, 0, 2))


def resblock_reference(x, params):
    """NumPy float64 reference with the exact PyTorch ResBlock math."""
    x = np.asarray(x, np.float64)
    w1, b1, w2, b2, ws, bs = [np.asarray(a, np.float64) for a in params]
    N, Cin, L = x.shape
    Cout = w1.shape[0]
    xpad = np.concatenate([x[:, :, :1], x, x[:, :, -1:]], axis=2)
    y1 = np.zeros((N, Cout, L))
    for k in range(3):                          # Conv1d = cross-correlation
        y1 += np.einsum('ncl,oc->nol', xpad[:, :, k:k + L], w1[:, :, k])
    y1 = np.maximum(y1 + b1[None, :, None], 0.0)
    y2 = np.einsum('ncl,oc->nol', y1, w2[:, :, 0]) + b2[None, :, None]
    sc = np.einsum('ncl,oc->nol', x, ws[:, :, 0]) + bs[None, :, None]
    return np.maximum(y2 + sc, 0.0)


if __name__ == "__main__":
    N, Cin, Cout, L = 2, 4, 8, 16

    key = jax.random.PRNGKey(0)
    kx, k1, k2, k3, k4, k5, k6 = jax.random.split(key, 7)

    x = jax.random.normal(kx, (N, Cin, L), dtype=jnp.float32)
    # Deterministic synthetic parameters (PyTorch Conv1d weight shapes).
    w1 = 0.1 * jax.random.normal(k1, (Cout, Cin, 3), dtype=jnp.float32)
    b1 = 0.1 * jax.random.normal(k2, (Cout,), dtype=jnp.float32)
    w2 = 0.1 * jax.random.normal(k3, (Cout, Cout, 1), dtype=jnp.float32)
    b2 = 0.1 * jax.random.normal(k4, (Cout,), dtype=jnp.float32)
    ws = 0.1 * jax.random.normal(k5, (Cout, Cin, 1), dtype=jnp.float32)
    bs = 0.1 * jax.random.normal(k6, (Cout,), dtype=jnp.float32)
    params = (w1, b1, w2, b2, ws, bs)

    ref = resblock_reference(x, params)          # NumPy float64 gold reference

    # f32 MXU-operand path.  Tolerance covers the MXU's bf16-pass evaluation
    # of f32 matmuls under default precision; structural errors (wrong tap,
    # missing bias/pad) would be orders of magnitude larger.
    out = jax.block_until_ready(resblock_forward(x, params))
    assert out.shape == (N, Cout, L), out.shape
    assert np.allclose(np.asarray(out), ref, atol=1e-2, rtol=1e-2), \
        float(np.max(np.abs(np.asarray(out) - ref)))

    # bf16 MXU-operand path (v6e/v7x review item); looser tolerance vs f64 ref.
    out_bf16 = jax.block_until_ready(
        resblock_forward(x, params, mxu_dtype=jnp.bfloat16))
    assert out_bf16.shape == (N, Cout, L), out_bf16.shape
    assert np.allclose(np.asarray(out_bf16), ref, atol=5e-2, rtol=5e-2), \
        float(np.max(np.abs(np.asarray(out_bf16) - ref)))

    print("KERNEL_OK")
</pallas_src>

<mosaic_0001>
module attributes {stable_mosaic.version = 11 : i64} {
  func.func @kernel(%arg0: memref<5x34xf32, #tpu.memory_space<vmem>>, %arg1: memref<3x8x5xf32, #tpu.memory_space<vmem>>, %arg2: memref<8x8xf32, #tpu.memory_space<vmem>>, %arg3: memref<8x5xf32, #tpu.memory_space<vmem>>, %arg4: memref<8x32xf32, #tpu.memory_space<vmem>>) attributes {dimension_semantics = [], scalar_prefetch = 0 : i64, scratch_operands = 0 : i64, tpu.core_type = #tpu.core_type<tc>} {
    %c0 = arith.constant 0 : index
    %c0_0 = arith.constant 0 : index
    %0 = vector.load %arg0[%c0, %c0_0] : memref<5x34xf32, #tpu.memory_space<vmem>>, vector<5x34xf32>
    %1 = vector.extract_strided_slice %0 {offsets = [0, 1], sizes = [5, 32], strides = [1, 1]} : vector<5x34xf32> to vector<5x32xf32>
    %2 = vector.extract_strided_slice %0 {offsets = [0, 0], sizes = [5, 32], strides = [1, 1]} : vector<5x34xf32> to vector<5x32xf32>
    %3 = vector.extract_strided_slice %0 {offsets = [0, 2], sizes = [5, 32], strides = [1, 1]} : vector<5x34xf32> to vector<5x32xf32>
    %4 = tpu.iota {dimensions = array<i32: 1>} : vector<5x32xi32>
    %c16_i32 = arith.constant 16 : i32
    %c0_i32 = arith.constant 0 : i32
    %5 = arith.cmpi eq, %c16_i32, %c0_i32 : i32
    %c1_i32 = arith.constant 1 : i32
    %6 = arith.select %5, %c1_i32, %c16_i32 : i32
    %7 = vector.broadcast %6 : i32 to vector<5x32xi32>
    %8 = arith.remsi %4, %7 : vector<5x32xi32>
    %c0_i32_1 = arith.constant 0 : i32
    %9 = vector.broadcast %c0_i32_1 : i32 to vector<5x32xi32>
    %10 = arith.cmpi ne, %8, %9 : vector<5x32xi32>
    %c0_i32_2 = arith.constant 0 : i32
    %11 = vector.broadcast %c0_i32_2 : i32 to vector<5x32xi32>
    %12 = arith.cmpi slt, %8, %11 : vector<5x32xi32>
    %c0_i32_3 = arith.constant 0 : i32
    %13 = arith.cmpi slt, %6, %c0_i32_3 : i32
    %14 = vector.broadcast %13 : i1 to vector<5x32xi1>
    %15 = vector.broadcast %14 : vector<5x32xi1> to vector<5x32xi1>
    %16 = arith.xori %12, %15 : vector<5x32xi1>
    %17 = arith.andi %16, %10 : vector<5x32xi1>
    %18 = vector.broadcast %6 : i32 to vector<5x32xi32>
    %19 = arith.addi %8, %18 : vector<5x32xi32>
    %20 = arith.select %17, %19, %8 : vector<5x32xi1>, vector<5x32xi32>
    %c0_i32_4 = arith.constant 0 : i32
    %21 = vector.broadcast %c0_i32_4 : i32 to vector<5x32xi32>
    %22 = arith.cmpi eq, %20, %21 : vector<5x32xi32>
    %23 = arith.select %22, %1, %2 : vector<5x32xi1>, vector<5x32xf32>
    %c15_i32 = arith.constant 15 : i32
    %24 = vector.broadcast %c15_i32 : i32 to vector<5x32xi32>
    %25 = arith.cmpi eq, %20, %24 : vector<5x32xi32>
    %26 = arith.select %25, %1, %3 : vector<5x32xi1>, vector<5x32xf32>
    %c1 = arith.constant 1 : index
    %c0_5 = arith.constant 0 : index
    %c0_6 = arith.constant 0 : index
    %27 = vector.load %arg1[%c1, %c0_5, %c0_6] : memref<3x8x5xf32, #tpu.memory_space<vmem>>, vector<1x8x5xf32>
    %28 = vector.shape_cast %27 : vector<1x8x5xf32> to vector<8x5xf32>
    %cst = arith.constant dense<0.000000e+00> : vector<8x32xf32>
    %29 = tpu.matmul %28, %1, %cst {dimension_numbers = #tpu.dot_dimension_numbers<[1], [0], [0], [1], [0, 0, 1, 1], [], []>} : vector<8x5xf32>, vector<5x32xf32>, vector<8x32xf32> -> vector<8x32xf32>
    %c0_7 = arith.constant 0 : index
    %c0_8 = arith.constant 0 : index
    %c0_9 = arith.constant 0 : index
    %30 = vector.load %arg1[%c0_7, %c0_8, %c0_9] : memref<3x8x5xf32, #tpu.memory_space<vmem>>, vector<1x8x5xf32>
    %31 = vector.shape_cast %30 : vector<1x8x5xf32> to vector<8x5xf32>
    %cst_10 = arith.constant dense<0.000000e+00> : vector<8x32xf32>
    %32 = tpu.matmul %31, %23, %cst_10 {dimension_numbers = #tpu.dot_dimension_numbers<[1], [0], [0], [1], [0, 0, 1, 1], [], []>} : vector<8x5xf32>, vector<5x32xf32>, vector<8x32xf32> -> vector<8x32xf32>
    %33 = arith.addf %29, %32 : vector<8x32xf32>
    %c2 = arith.constant 2 : index
    %c0_11 = arith.constant 0 : index
    %c0_12 = arith.constant 0 : index
    %34 = vector.load %arg1[%c2, %c0_11, %c0_12] : memref<3x8x5xf32, #tpu.memory_space<vmem>>, vector<1x8x5xf32>
    %35 = vector.shape_cast %34 : vector<1x8x5xf32> to vector<8x5xf32>
    %cst_13 = arith.constant dense<0.000000e+00> : vector<8x32xf32>
    %36 = tpu.matmul %35, %26, %cst_13 {dimension_numbers = #tpu.dot_dimension_numbers<[1], [0], [0], [1], [0, 0, 1, 1], [], []>} : vector<8x5xf32>, vector<5x32xf32>, vector<8x32xf32> -> vector<8x32xf32>
    %37 = arith.addf %33, %36 : vector<8x32xf32>
    %cst_14 = arith.constant 0.000000e+00 : f32
    %38 = vector.broadcast %cst_14 : f32 to vector<8x32xf32>
    %39 = arith.maximumf %37, %38 : vector<8x32xf32>
    %c0_15 = arith.constant 0 : index
    %c0_16 = arith.constant 0 : index
    %40 = vector.load %arg2[%c0_15, %c0_16] : memref<8x8xf32, #tpu.memory_space<vmem>>, vector<8x8xf32>
    %cst_17 = arith.constant dense<0.000000e+00> : vector<8x32xf32>
    %41 = tpu.matmul %40, %39, %cst_17 {dimension_numbers = #tpu.dot_dimension_numbers<[1], [0], [0], [1], [0, 0, 1, 1], [], []>} : vector<8x8xf32>, vector<8x32xf32>, vector<8x32xf32> -> vector<8x32xf32>
    %c0_18 = arith.constant 0 : index
    %c0_19 = arith.constant 0 : index
    %42 = vector.load %arg3[%c0_18, %c0_19] : memref<8x5xf32, #tpu.memory_space<vmem>>, vector<8x5xf32>
    %cst_20 = arith.constant dense<0.000000e+00> : vector<8x32xf32>
    %43 = tpu.matmul %42, %1, %cst_20 {dimension_numbers = #tpu.dot_dimension_numbers<[1], [0], [0], [1], [0, 0, 1, 1], [], []>} : vector<8x5xf32>, vector<5x32xf32>, vector<8x32xf32> -> vector<8x32xf32>
    %44 = arith.addf %41, %43 : vector<8x32xf32>
    %cst_21 = arith.constant 0.000000e+00 : f32
    %45 = vector.broadcast %cst_21 : f32 to vector<8x32xf32>
    %46 = arith.maximumf %44, %45 : vector<8x32xf32>
    %c0_22 = arith.constant 0 : index
    %c0_23 = arith.constant 0 : index
    %47 = vector.load %arg4[%c0_22, %c0_23] : memref<8x32xf32, #tpu.memory_space<vmem>>, vector<8x32xf32>
    tpu.vector_store %arg4[%c0_22, %c0_23], %46 {strides = array<i32>} : memref<8x32xf32, #tpu.memory_space<vmem>>, vector<8x32xf32>,
    return
  }
}

</mosaic_0001>

<bundles_post_ra>
// kernel: tpu_custom_call.1
= control target key start
LH: loop header
LB: loop body
LE: loop exit
PB: predicated region body
PF: predicated region fallthrough
CT: control target
= control target key end

     0   :  { %s519_s17 = smov 127   ;;  %v520_v1 = vmov 0.0   ;;  %vm521_vm0 = vmmov 0   ;;  %s583_s0 = inlined_call_operand.vmem [shape: f32[5,34], index: 0, kind: input, shape index: {}]   ;;  %s584_s1 = inlined_call_operand.vmem [shape: f32[3,8,5], index: 1, kind: input, shape index: {}]   ;;  %s585_s2 = inlined_call_operand.vmem [shape: f32[8,8], index: 2, kind: input, shape index: {}]   ;;  %s586_s3 = inlined_call_operand.vmem [shape: f32[8,5], index: 3, kind: input, shape index: {}]   ;;  %s587_s4 = inlined_call_operand.hbm [shape: f32[8,32], index: 4, kind: output, shape index: {}]  }
   0x1   :  { %v18_v0 = vld [vmem:[%s583_s0] sm:$0x1f]  ;;  %472 = vmatprep.subr.mxu1 %v520_v1  ;;  %467 = vmatprep.subr.mxu0 %v520_v1 }
   0x2   :  { %35 = vrot.lane.b32.xlu0 %v18_v0, %s519_s17  ;;  %469 = vmatprep.mubr.msk.f32.mxu0 %vm521_vm0, %v520_v1 }
   0x3   :  { %9 = vsyncpa [#allocation3], 0  ;;  %474 = vmatprep.mubr.msk.f32.mxu1 %vm521_vm0, %v520_v1  ;;  %s522_s18 = smov 126   ;;  %v19_v2 = vlaneseq  ;;  %vm51_vm1 = vcmask 1044480   ;;  %v46_v6 = vld [vmem:[%s584_s1] sm:$0xff]  ;;  %vm47_vm3 = vcmask 39936  }
   0x4   :  { %v446_v7 = vld [vmem:[%s584_s1 + $0x8] sm:$0xff]  ;;  %v451_v10 = vld [vmem:[%s584_s1 + $0x10] sm:$0xff]  ;;  %v281_v12 = vld [vmem:[%s586_s3] sm:$0xff]  ;;  %vm355_vm5 = vcmask 64512   ;;  %s523_s3 = smov [#allocation2]   ;;  %vm430_vm6 = vcmask 261120  }
   0x5   :  { %v20_v3 = vand.u32 127, %v19_v2  ;;  %v280_v22 = vld [vmem:[%s585_s2] sm:$0xff]  ;;  %s438_s27 = sshll.u32 %s523_s3, 4  ;;  %s439_s27 = int_to_ptr.vmem [resolvable:$true] %s438_s27 }
   0x6   :  { %40 = vrot.lane.b32.xlu0 %v18_v0, %s522_s18  ;;  %s497_s28 = scalar_lea.vmem %s439_s27, 128  ;;  %p502_p1 = scmp.lt.s32.totalorder %s439_s27, %s439_s27 }
   0x7   :  { %v25_v4 = vand.u32 15, %v20_v3  ;;  %p498_p0 = scmp.ne.s32.totalorder %s439_s27, %s497_s28  ;;  %p503_p2 = scmp.lt.s32.totalorder %s497_s28, %s497_s28 }
   0x9   :  { %vm33_vm2 = vcmp.eq.s32.totalorder %v25_v4, 0  ;;  %vm39_vm4 = vcmp.eq.s32.totalorder %v25_v4, 15  ;;  %p504_p3 = por %p503_p2, %p502_p1 }
   0xb   :  { %p505_p4 = pnand %p504_p3, %p498_p0 }
  0x74   :  { %v36_v5 = vpop.permute.xlu0 %35 }
  0x75   :  { %473 = vmatpush3.msk.msra.mxu1 %vm51_vm1, %v36_v5  ;;  %v38_v8 = vsel %vm33_vm2, %v36_v5, %v18_v0 }
  0x76   :  { %468 = vmatpush3.msk.msra.mxu0 %vm51_vm1, %v38_v8  ;;  %482 = vmatprep.subr.mxu1 %v520_v1 }
  0x77   :  { %470 = vmatmul.mubr.msk.f32.vlgmr.msra.gmra.mxu0 %vm47_vm3, %v46_v6  ;;  %475 = vmatmul.mubr.msk.f32.vlgmr.msra.gmra.mxu1 %vm47_vm3, %v446_v7 }
  0x78   :  { %483 = vmatpush3.msk.msra.mxu1 %vm51_vm1, %v36_v5  ;;  %v41_v9 = vpop.permute.xlu0 %40  ;;  %477 = vmatprep.subr.mxu0 %v520_v1 }
  0x79   :  { %v43_v11 = vsel %vm39_vm4, %v36_v5, %v41_v9  ;;  %479 = vmatprep.mubr.msk.f32.mxu0 %vm521_vm0, %v520_v1  ;;  %484 = vmatprep.mubr.msk.f32.mxu1 %vm521_vm0, %v520_v1 }
  0x7a   :  { %478 = vmatpush3.msk.msra.mxu0 %vm51_vm1, %v43_v11 }
  0x7b   :  { %480 = vmatmul.mubr.msk.f32.vlgmr.msra.gmra.mxu0 %vm47_vm3, %v451_v10  ;;  %487 = vmatprep.subr.mxu0 %v520_v1 }
  0x7c   :  { %489 = vmatprep.mubr.msk.f32.mxu0 %vm521_vm0, %v520_v1  ;;  %485 = vmatmul.mubr.msk.f32.vlgmr.msra.gmra.mxu1 %vm47_vm3, %v281_v12 }
 0x137   :  { %v121_v13 = vpop.f32.mrf.mxu0  ;;  %v196_v14 = vpop.f32.mrf.mxu1 }
 0x138   :  { %v197_v17 = vadd.f32 %v196_v14, %v121_v13 }
 0x139   :  { %v471_v15 = vpop.f32.mrf.mxu0  ;;  %v476_v16 = vpop.f32.mrf.mxu1 }
 0x13b   :  { %v274_v18 = vpop.f32.mrf.mxu0 }
 0x13c   :  { %v278_v19 = vadd.f32 %v274_v18, %v197_v17  ;;  %v351_v23 = vpop.f32.mrf.mxu1 }
 0x13d   :  { %v481_v20 = vpop.f32.mrf.mxu0 }
 0x13e   :  { %v279_v21 = vmax.f32 %v278_v19, 0.0  ;;  %v486_v24 = vpop.f32.mrf.mxu1 }
 0x140   :  { %488 = vmatpush3.msra.mxu0 %v279_v21 }
 0x141   :  { %490 = vmatmul.mubr.msk.f32.vlgmr.msra.gmra.mxu0 %vm355_vm5, %v280_v22 }
 0x201   :  { %v425_v25 = vpop.f32.mrf.mxu0 }
 0x202   :  { %v426_v26 = vadd.f32 %v425_v25, %v351_v23 }
 0x203   :  { %v491_v27 = vpop.f32.mrf.mxu0 }
 0x204   :  { %v429_v28 = vmax.f32 %v426_v26, 0.0 }
 0x206   :  { %431 = vst.msk [vmem:[#allocation2] sm:$0xff] %vm430_vm6, %v429_v28 }
 0x207   :  { %508 = shalt.err (!%p505_p4)
}
 0x208   :  { %441 = dma.vmem_to_hbm [thread:$0]  %s439_s27, 128, %s587_s4, [#allocation3]  }
 0x209   :  { %517 = dma.done.wait [#allocation3], 128  }
 0x20a   :  { %518 = vsyncadd [#allocation3], 4294967168 }
 0x20b   :  { %445 = vsyncpa [#allocation3], 1 }

</bundles_post_ra>
